<compile_context>
chip_gen: v5e
topology: v5e:2x2
jax: 0.10.0
libtpu: 0.0.40
codegen_flags: <defaults>
</compile_context>

<pallas_src>
import jax
import jax.numpy as jnp
from jax.experimental import pallas as pl
from jax.experimental.pallas import tpu as pltpu


def _pfn_pooled_kernel(x_ref, w_ref, shift_ref, out_ref):
    # x_ref:     (tile_n, P*C_in)   voxel-major, point*channel flattened on lanes
    # w_ref:     (P*C_in, P*C_out)  block-diag replicated Linear weight * BN scale (bf16)
    # shift_ref: (1, P*C_out)       eval-mode BN shift, tiled per point group (f32)
    # out_ref:   (tile_n, C_out)    pooled (max over points) features (f32)
    out_ch = out_ref.shape[-1]
    width = w_ref.shape[-1]          # P * C_out, multiple of 128

    x = x_ref[...]
    if x.dtype != w_ref.dtype:
        x = x.astype(w_ref.dtype)    # bf16 MXU operands (VPU cast, hidden under DMA)

    # Linear (with BN scale folded into the columns) for all P points of the
    # tile in one lane-dense MXU matmul, f32 accumulation.
    y = jnp.dot(x, w_ref[...], preferred_element_type=jnp.float32)

    # Eval-mode BatchNorm shift + ReLU (VPU; hidden under the input DMA).
    # TODO(synk): training-mode BatchNorm (batch statistics over all voxels)
    # would need a cross-tile reduction; only eval-mode semantics implemented.
    y = jnp.maximum(y + shift_ref[...], 0.0)

    # Max over the P point groups, entirely in lane space:
    #  1) fold 128-lane (vreg-aligned, free) chunks together,
    #  2) log2 tree of XLU lane rotations down to C_out lanes.
    m = y[:, 0:128]
    for k in range(1, width // 128):
        m = jnp.maximum(m, y[:, k * 128:(k + 1) * 128])
    span = 128
    while span > out_ch:
        span //= 2
        m = jnp.maximum(m, pltpu.roll(m, shift=128 - span, axis=1))

    out_ref[...] = m[:, 0:out_ch].astype(out_ref.dtype)


def _device_tile_defaults():
    """(default_tile, vmem_limit_bytes) from the local chip's VMEM capacity."""
    vmem_bytes = 64 * 1024 * 1024
    try:
        vmem_bytes = int(pltpu.get_tpu_info().vmem_capacity_bytes)
    except Exception:
        pass
    if vmem_bytes >= 96 * 1024 * 1024:
        # v5e / v6e: 128 MiB physical VMEM — amortize per-step overhead.
        return 8192, 64 * 1024 * 1024
    # v7x: 64 MiB per TensorCore — stay within the 32 MiB scoped default.
    return 2048, 32 * 1024 * 1024


def pfn_layer_forward(inputs, weight, gamma, beta, running_mean, running_var,
                      *, eps=1e-3, last_layer=False, tile_n=None,
                      matmul_dtype=jnp.bfloat16, out_dtype=jnp.float32,
                      training=False):
    """Forward pass of the spec PFNLayer (use_norm=True, eval-mode BN)."""
    assert not training, "only eval-mode BatchNorm (running stats) is implemented"
    n, p, c_in = inputs.shape
    out_ch, w_cin = weight.shape
    assert w_cin == c_in
    if not last_layer:
        # The spec's torch.cat([x, x_repeat], dim=2) requires P == out_channels//2.
        assert p == out_ch, "reference torch.cat needs num_points == out_channels//2"
    width_in, width_out = p * c_in, p * out_ch
    # Lane-space pooling assumptions (hold for the pcdet config P = C_out = 16).
    assert width_out % 128 == 0 and 128 % out_ch == 0, \
        "lane pooling tree needs P*C_out % 128 == 0 and C_out | 128"

    default_tile, vmem_limit = _device_tile_defaults()
    if tile_n is None:
        tile_n = default_tile

    # ---- one-time parameter prep (tiny, stays in XLA outside the kernel) ----
    inv_std = 1.0 / jnp.sqrt(running_var.astype(jnp.float32) + eps)
    scale = gamma.astype(jnp.float32) * inv_std                       # (C_out,)
    shift = beta.astype(jnp.float32) - running_mean.astype(jnp.float32) * scale
    shift_t = jnp.tile(shift, p)[None, :]                             # (1, P*C_out)
    # Block-diagonal replicated weight with the per-output-channel BN scale
    # folded into each column: wbig[q*C_in+c, q*C_out+o] = W[o, c] * scale[o].
    w_scaled = weight.T.astype(jnp.float32) * scale[None, :]          # (C_in, C_out)
    eye_p = jnp.eye(p, dtype=jnp.float32)
    wbig = jnp.einsum("pq,co->pcqo", eye_p, w_scaled)
    wbig = wbig.reshape(width_in, width_out).astype(matmul_dtype)

    # ---- lane-dense input view: (N, P, C_in) -> (N, P*C_in) is a free reshape.
    # Dtype passthrough: bf16 activations from the producer halve the input DMA.
    x2 = inputs.reshape(n, width_in)

    # ---- tiling: large enough to amortize ~0.35 us/step overhead, small
    # enough for VMEM, and capped so the grid has >= ~4 steps, letting the
    # ("parallel",) axis shard across both v7x TensorCores. Ragged last block
    # rows past N are computed on stale VMEM and dropped by the output pipeline.
    if n <= 8:
        tile = n                                    # single full block (legal)
    else:
        cap = ((pl.cdiv(n, 4) + 7) // 8) * 8        # >= ~4 grid steps when possible
        tile = max(8, (min(tile_n, cap) // 8) * 8)  # multiple of 8 sublanes
    grid = (pl.cdiv(n, tile),)

    pooled = pl.pallas_call(
        _pfn_pooled_kernel,
        out_shape=jax.ShapeDtypeStruct((n, out_ch), jnp.float32),
        grid_spec=pltpu.PrefetchScalarGridSpec(
            num_scalar_prefetch=0,
            grid=grid,
            in_specs=[
                pl.BlockSpec((tile, width_in), lambda i: (i, 0)),
                pl.BlockSpec((width_in, width_out), lambda i: (0, 0)),
                pl.BlockSpec((1, width_out), lambda i: (0, 0)),
            ],
            out_specs=pl.BlockSpec((tile, out_ch), lambda i: (i, 0)),
        ),
        compiler_params=pltpu.CompilerParams(
            dimension_semantics=("parallel",),       # megacore-shardable on v7x
            vmem_limit_bytes=vmem_limit),
    )(x2, wbig, shift_t)

    pooled = pooled.astype(out_dtype)
    if last_layer:
        return pooled[:, None, :]                                    # x_max (N,1,C_out)

    # Broadcast/concat epilogue of the spec module, rebuilt outside the kernel:
    # torch: x (N, C_out, 1) ++ x_repeat (N, P, C_out) on dim=2 -> (N, P, C_out+1).
    x_col = pooled[:, :, None]
    x_rep = jnp.broadcast_to(pooled[:, None, :], (n, p, out_ch))
    return jnp.concatenate([x_col, x_rep], axis=2)


def pfn_layer_ref(inputs, weight, gamma, beta, running_mean, running_var, eps=1e-3):
    """Pure-JAX reference mirroring the torch forward (eval-mode BN)."""
    x = jnp.einsum("npc,oc->npo", inputs, weight)
    x = (x - running_mean) / jnp.sqrt(running_var + eps) * gamma + beta
    x = jnp.maximum(x, 0.0)
    n, p, out_ch = x.shape
    pooled = jnp.max(x, axis=1)                                      # (N, C_out)
    x_col = pooled[:, :, None]                                       # (N, C_out, 1)
    x_rep = jnp.broadcast_to(pooled[:, None, :], (n, p, out_ch))
    return jnp.concatenate([x_col, x_rep], axis=2)


if __name__ == "__main__":
    # PFNLayer(in_channels=10, out_channels=32, use_norm=True, last_layer=False)
    # -> internal out_channels = 32 // 2 = 16; num_points = 16 so the reference
    # torch.cat([x, x_repeat], dim=2) is shape-valid.  N is deliberately NOT a
    # multiple of the tile size to exercise ragged (partial) last blocks.
    N, P, C_IN, OUT = 200, 16, 10, 16
    key = jax.random.PRNGKey(0)
    k = jax.random.split(key, 6)
    inputs = jax.random.normal(k[0], (N, P, C_IN), jnp.float32)
    weight = 0.1 * jax.random.normal(k[1], (OUT, C_IN), jnp.float32)   # nn.Linear (out,in)
    gamma = 1.0 + 0.1 * jax.random.normal(k[2], (OUT,), jnp.float32)   # BN weight
    beta = 0.1 * jax.random.normal(k[3], (OUT,), jnp.float32)          # BN bias
    running_mean = 0.05 * jax.random.normal(k[4], (OUT,), jnp.float32)
    running_var = 0.5 + 0.5 * jnp.abs(jax.random.normal(k[5], (OUT,), jnp.float32))

    ref = pfn_layer_ref(inputs, weight, gamma, beta, running_mean, running_var)

    # Default path: bf16 MXU operands / f32 accumulation, device-tuned tiling,
    # multi-step grid (megacore-shardable), ragged last block.
    out = pfn_layer_forward(inputs, weight, gamma, beta, running_mean, running_var)
    out = jax.block_until_ready(out)
    assert out.shape == (N, P, OUT + 1), out.shape
    assert jnp.allclose(out, ref, atol=3e-2, rtol=3e-2), \
        float(jnp.max(jnp.abs(out - ref)))

    # f32-matmul path at tight tolerance (validates structure exactly) with
    # explicit small tiles exercising a longer grid.
    out_f32 = pfn_layer_forward(inputs, weight, gamma, beta, running_mean,
                                running_var, tile_n=64,
                                matmul_dtype=jnp.float32)
    out_f32 = jax.block_until_ready(out_f32)
    assert jnp.allclose(out_f32, ref, atol=1e-4, rtol=1e-4)

    # last_layer=True path returns just the pooled (N, 1, C_out) features.
    out_last = pfn_layer_forward(inputs, weight, gamma, beta, running_mean,
                                 running_var, last_layer=True,
                                 matmul_dtype=jnp.float32)
    out_last = jax.block_until_ready(out_last)
    assert out_last.shape == (N, 1, OUT)
    assert jnp.allclose(out_last[:, 0, :], ref[:, :, 0], atol=1e-4, rtol=1e-4)

    print("KERNEL_OK")
</pallas_src>

<mosaic_0001>
module attributes {stable_mosaic.version = 11 : i64} {
  func.func @_pfn_pooled_kernel(%arg0: i32, %arg1: memref<56x160xf32, #tpu.memory_space<vmem>>, %arg2: memref<160x256xbf16, #tpu.memory_space<vmem>>, %arg3: memref<1x256xf32, #tpu.memory_space<vmem>>, %arg4: memref<56x16xf32, #tpu.memory_space<vmem>>) attributes {dimension_semantics = [#tpu.dimension_semantics<parallel>], iteration_bounds = array<i64: 4>, scalar_prefetch = 0 : i64, scratch_operands = 0 : i64, tpu.core_type = #tpu.core_type<tc>, window_params = [{transform_indices = @transform_0, window_bounds = array<i64: 56, 160>}, {pipeline_mode = #tpu.pipeline_mode<synchronous>, transform_indices = @transform_1, window_bounds = array<i64: 160, 256>}, {pipeline_mode = #tpu.pipeline_mode<synchronous>, transform_indices = @transform_2, window_bounds = array<i64: 1, 256>}, {transform_indices = @transform_3, window_bounds = array<i64: 56, 16>}]} {
    %c0 = arith.constant 0 : index
    %c0_0 = arith.constant 0 : index
    %0 = vector.load %arg1[%c0, %c0_0] : memref<56x160xf32, #tpu.memory_space<vmem>>, vector<56x160xf32>
    %1 = arith.truncf %0 : vector<56x160xf32> to vector<56x160xbf16>
    %c0_1 = arith.constant 0 : index
    %c0_2 = arith.constant 0 : index
    %2 = vector.load %arg2[%c0_1, %c0_2] : memref<160x256xbf16, #tpu.memory_space<vmem>>, vector<160x256xbf16>
    %cst = arith.constant dense<0.000000e+00> : vector<56x256xf32>
    %3 = tpu.matmul %1, %2, %cst {dimension_numbers = #tpu.dot_dimension_numbers<[1], [0], [0], [1], [0, 0, 1, 1], [], []>} : vector<56x160xbf16>, vector<160x256xbf16>, vector<56x256xf32> -> vector<56x256xf32>
    %c0_3 = arith.constant 0 : index
    %c0_4 = arith.constant 0 : index
    %4 = vector.load %arg3[%c0_3, %c0_4] : memref<1x256xf32, #tpu.memory_space<vmem>>, vector<1x256xf32>
    %5 = vector.broadcast %4 : vector<1x256xf32> to vector<56x256xf32>
    %6 = arith.addf %3, %5 : vector<56x256xf32>
    %cst_5 = arith.constant 0.000000e+00 : f32
    %7 = vector.broadcast %cst_5 : f32 to vector<56x256xf32>
    %8 = arith.maximumf %6, %7 : vector<56x256xf32>
    %9 = vector.extract_strided_slice %8 {offsets = [0, 0], sizes = [56, 128], strides = [1, 1]} : vector<56x256xf32> to vector<56x128xf32>
    %10 = vector.extract_strided_slice %8 {offsets = [0, 128], sizes = [56, 128], strides = [1, 1]} : vector<56x256xf32> to vector<56x128xf32>
    %11 = arith.maximumf %9, %10 : vector<56x128xf32>
    %c64_i32 = arith.constant 64 : i32
    %12 = tpu.dynamic_rotate %11 by %c64_i32 dim 1 : vector<56x128xf32>, i32 -> vector<56x128xf32>
    %13 = arith.maximumf %11, %12 : vector<56x128xf32>
    %c96_i32 = arith.constant 96 : i32
    %14 = tpu.dynamic_rotate %13 by %c96_i32 dim 1 : vector<56x128xf32>, i32 -> vector<56x128xf32>
    %15 = arith.maximumf %13, %14 : vector<56x128xf32>
    %c112_i32 = arith.constant 112 : i32
    %16 = tpu.dynamic_rotate %15 by %c112_i32 dim 1 : vector<56x128xf32>, i32 -> vector<56x128xf32>
    %17 = arith.maximumf %15, %16 : vector<56x128xf32>
    %18 = vector.extract_strided_slice %17 {offsets = [0, 0], sizes = [56, 16], strides = [1, 1]} : vector<56x128xf32> to vector<56x16xf32>
    %c0_6 = arith.constant 0 : index
    %c0_7 = arith.constant 0 : index
    %19 = vector.load %arg4[%c0_6, %c0_7] : memref<56x16xf32, #tpu.memory_space<vmem>>, vector<56x16xf32>
    tpu.vector_store %arg4[%c0_6, %c0_7], %18 {strides = array<i32>} : memref<56x16xf32, #tpu.memory_space<vmem>>, vector<56x16xf32>,
    return
  }
  func.func @transform_0(%arg0: i32) -> (i32, i32) {
    %c0_i32 = arith.constant 0 : i32
    %c0_i32_0 = arith.constant 0 : i32
    return %arg0, %c0_i32 : i32, i32
  }
  func.func @transform_1(%arg0: i32) -> (i32, i32) {
    %c0_i32 = arith.constant 0 : i32
    %c0_i32_0 = arith.constant 0 : i32
    %c0_i32_1 = arith.constant 0 : i32
    return %c0_i32, %c0_i32_0 : i32, i32
  }
  func.func @transform_2(%arg0: i32) -> (i32, i32) {
    %c0_i32 = arith.constant 0 : i32
    %c0_i32_0 = arith.constant 0 : i32
    %c0_i32_1 = arith.constant 0 : i32
    return %c0_i32, %c0_i32_0 : i32, i32
  }
  func.func @transform_3(%arg0: i32) -> (i32, i32) {
    %c0_i32 = arith.constant 0 : i32
    %c0_i32_0 = arith.constant 0 : i32
    return %arg0, %c0_i32 : i32, i32
  }
}

</mosaic_0001>

<bundles_post_ra>
// kernel: tpu_custom_call.1
= control target key start
LH: loop header
LB: loop body
LE: loop exit
PB: predicated region body
PF: predicated region fallthrough
CT: control target
= control target key end

     0   :  { %s1146_s12 = smov 0   ;;  %s1148_s13 = smov 0   ;;  %s1440_s0 = inlined_call_operand.vmem [shape: f32[200,160], index: 0, kind: input, shape index: {}]   ;;  %s1441_s1 = inlined_call_operand.vmem [shape: bf16[160,256], index: 1, kind: input, shape index: {}]   ;;  %s1442_s2 = inlined_call_operand.vmem [shape: f32[1,256], index: 2, kind: input, shape index: {}]   ;;  %s1443_s3 = inlined_call_operand.vmem [shape: f32[200,16], index: 3, kind: output, shape index: {}]  }
   0x1   :  { %s1150_s14 = smov 0  }
   0x2 LB: > { %s1159_s15 = sadd.s32 4294967295, %s1089_s14   ;;  %s1161_s16 = sadd.s32 1, %s1089_s14   ;;  %s1089_s14 = sphi %s1150_s14, %s1450_s14   ;;  %s1085_s13 = sphi %s1148_s13, %s1449_s13   ;;  %s1081_s12 = sphi %s1146_s12, %s1448_s12  }
   0x3   : > { %s85_s17 = ssub.s32 %s1089_s14, %s1161_s16  ;;  %s88_s18 = sadd.s32 1, %s1085_s13 }
   0x4   : > { %p86_p0 = scmp.eq.s32.totalorder %s85_s17, 0  ;;  %p98_p1 = scmp.ne.s32.totalorder %s1085_s13, %s1081_s12 }
   0x5   : > { %p99_p2 = scmp.eq.s32.totalorder %s1159_s15, 3  ;;  %p811_p3 = scmp.ge.s32.totalorder %s1089_s14, 1 }
   0x6   : > { %s1169_s19 = scalar_select %p86_p0, %s1085_s13, %s88_s18  }
   0x7   : > { %p1171_p4 = por %p99_p2, %p98_p1  ;;  %p149_p5 = scmp.lt.s32.totalorder %s1089_s14, 5 }
   0x9   : > { %p150_p6 = pnand %p811_p3, %p149_p5 }
   0xa   : > { %s1245_s25 = smul.u32 (!%p150_p6), 7, %s1159_s15  ;;  %s1123_s27 = smov (!%p150_p6), 64  }
   0xb   : > { %153 = sbr.rel (%p150_p6) target bundleno = 622 (0x26e), region = 32  ;;  %s1125_s29 = smov (!%p150_p6), 112  }
   0xc   : > { %p184_p7 = scmp.lt.s32.totalorder (!%p150_p6), %s1245_s25, 24  ;;  %s175_s30 = sand.u32 (!%p150_p6), 1, %s1081_s12  }
   0xd   : > { %s936_s4 = smul.u32 (!%p150_p6), 56, %s175_s30 }
   0xf   : > { %s1364_s5 = scalar_lea.vmem (!%p150_p6), [#allocation2], %s936_s4  }
  0x10   : > { %v872_v0 = vld [vmem:[%s1441_s1 + $0x70] sm:$0xf]  ;;  %v930_v1 = vld [vmem:[%s1441_s1 + $0x74] sm:$0xf0]  ;;  %v929_v2 = vld [vmem:[%s1441_s1 + $0x74] sm:$0xf] }
  0x11   : > { %v873_v3 = vor.u32 %v930_v1, %v872_v0  ;;  %v874_v4 = vld [vmem:[%s1441_s1 + $0x78] sm:$0xf0]  ;;  %v864_v5 = vld [vmem:[%s1441_s1 + $0x60] sm:$0xf]  ;;  %v928_v6 = vld [vmem:[%s1441_s1 + $0x64] sm:$0xf0] }
  0x12   : > { %v877_v7 = vor.u32 %v929_v2, %v874_v4  ;;  %v927_v8 = vld [vmem:[%s1441_s1 + $0x64] sm:$0xf]  ;;  %v866_v9 = vld [vmem:[%s1441_s1 + $0x68] sm:$0xf0]  ;;  %v865_v10 = vor.u32 %v928_v6, %v864_v5  ;;  %v856_v12 = vld [vmem:[%s1441_s1 + $0x50] sm:$0xf] }
  0x13   : > { %362 = vmatpush.bf16.msra.mxu0 %v873_v3  ;;  %v869_v11 = vor.u32 %v927_v8, %v866_v9  ;;  %v926_v13 = vld [vmem:[%s1441_s1 + $0x54] sm:$0xf0]  ;;  %v925_v14 = vld [vmem:[%s1441_s1 + $0x54] sm:$0xf]  ;;  %v858_v15 = vld [vmem:[%s1441_s1 + $0x58] sm:$0xf0] }
  0x14   : > { %418 = vmatpush.bf16.msra.mxu2 %v877_v7  ;;  %v933_v16 = vld [vmem:[%s1441_s1 + $0x94] sm:$0xf]  ;;  %v857_v17 = vor.u32 %v926_v13, %v856_v12  ;;  %v890_v18 = vld [vmem:[%s1441_s1 + $0x98] sm:$0xf0]  ;;  %v861_v19 = vor.u32 %v925_v14, %v858_v15  ;;  %v848_v20 = vld [vmem:[%s1441_s1 + $0x40] sm:$0xf] }
  0x15   : > { %v924_v21 = vld [vmem:[%s1441_s1 + $0x44] sm:$0xf0]  ;;  %v893_v22 = vor.u32 %v933_v16, %v890_v18  ;;  %v931_v23 = vld [vmem:[%s1441_s1 + $0x84] sm:$0xf]  ;;  %v850_v25 = vld [vmem:[%s1441_s1 + $0x48] sm:$0xf0] }
  0x16   : > { %v923_v24 = vld [vmem:[%s1441_s1 + $0x44] sm:$0xf]  ;;  %v882_v26 = vld [vmem:[%s1441_s1 + $0x88] sm:$0xf0]  ;;  %v888_v28 = vld [vmem:[%s1441_s1 + $0x90] sm:$0xf]  ;;  %v849_v30 = vor.u32 %v924_v21, %v848_v20 }
  0x17   : > { %363 = vmatpush.bf16.msra.mxu0 %v865_v10  ;;  %452 = vmatpush.bf16.msra.mxu3 %v893_v22  ;;  %v885_v27 = vor.u32 %v931_v23, %v882_v26  ;;  %v934_v29 = vld [vmem:[%s1441_s1 + $0x94] sm:$0xf0]  ;;  %v840_v31 = vld [vmem:[%s1441_s1 + $0x30] sm:$0xf]  ;;  %v853_v33 = vor.u32 %v923_v24, %v850_v25  ;;  %v880_v35 = vld [vmem:[%s1441_s1 + $0x80] sm:$0xf] }
  0x18   : > { %419 = vmatpush.bf16.msra.mxu2 %v869_v11  ;;  %v889_v32 = vor.u32 %v934_v29, %v888_v28  ;;  %v922_v34 = vld [vmem:[%s1441_s1 + $0x34] sm:$0xf0]  ;;  %v932_v36 = vld [vmem:[%s1441_s1 + $0x84] sm:$0xf0]  ;;  %v921_v37 = vld [vmem:[%s1441_s1 + $0x34] sm:$0xf] }
  0x19   : > { %v842_v38 = vld [vmem:[%s1441_s1 + $0x38] sm:$0xf0]  ;;  %v881_v39 = vor.u32 %v932_v36, %v880_v35  ;;  %v841_v40 = vor.u32 %v922_v34, %v840_v31  ;;  %s185_s9 = scalar_select %p184_p7, %s1245_s25, 24  ;;  %v832_v42 = vld [vmem:[%s1441_s1 + $0x20] sm:$0xf]  ;;  %vm349_vm0 = vcmask 261120  }
  0x1a   : > { %396 = vmatpush.bf16.msra.mxu1 %v889_v32  ;;  %v845_v41 = vor.u32 %v921_v37, %v842_v38  ;;  %v920_v43 = vld [vmem:[%s1441_s1 + $0x24] sm:$0xf0]  ;;  %v919_v44 = vld [vmem:[%s1441_s1 + $0x24] sm:$0xf]  ;;  %v834_v45 = vld [vmem:[%s1441_s1 + $0x28] sm:$0xf0] }
  0x1b   : > { %364 = vmatpush.bf16.msra.mxu0 %v857_v17  ;;  %453 = vmatpush.bf16.msra.mxu3 %v885_v27  ;;  %s914_s24 = sshll.u32 %s185_s9, 4  ;;  %v833_v46 = vor.u32 %v920_v43, %v832_v42  ;;  %v837_v49 = vor.u32 %v919_v44, %v834_v45  ;;  %v824_v50 = vld [vmem:[%s1441_s1 + $0x10] sm:$0xf]  ;;  %v918_v51 = vld [vmem:[%s1441_s1 + $0x14] sm:$0xf0]  ;;  %vm558_vm1 = vcmask 130048  }
  0x1c   : > { %420 = vmatpush.bf16.msra.mxu2 %v861_v19  ;;  %s1279_s28 = scalar_lea.vmem %s1440_s0, %s914_s24  ;;  %v917_v53 = vld [vmem:[%s1441_s1 + $0x14] sm:$0xf]  ;;  %v826_v54 = vld [vmem:[%s1441_s1 + $0x18] sm:$0xf0]  ;;  %v825_v55 = vor.u32 %v918_v51, %v824_v50  ;;  %v816_v57 = vld [vmem:[%s1441_s1] sm:$0xf] }
  0x1d   : > { %v202_v47 = vld [vmem:[%s1279_s28 + $0x8] sm:$0xff]  ;;  %v204_v48 = vld [vmem:[%s1279_s28 + $0x18] sm:$0xff]  ;;  %v829_v56 = vor.u32 %v917_v53, %v826_v54  ;;  %v915_v59 = vld [vmem:[%s1441_s1 + $0x4] sm:$0xf]  ;;  %s574_s12 = ssub.s32 (%p1171_p4), 25, %s1245_s25  ;;  %s935_s6 = smul.u32 (%p1171_p4), 56, %s1159_s15 }
  0x1e   : > { %397 = vmatpush.bf16.msra.mxu1 %v881_v39  ;;  %v216_v52 = vpack.c.bf16 %v204_v48, %v202_v47  ;;  %v916_v58 = vld [vmem:[%s1441_s1 + $0x4] sm:$0xf0]  ;;  %v818_v60 = vld [vmem:[%s1441_s1 + $0x8] sm:$0xf0]  ;;  %v201_v62 = vld [vmem:[%s1279_s28] sm:$0xff]  ;;  %p575_p8 = scmp.lt.s32.totalorder (%p1171_p4), %s574_s12, 7 }
  0x1f   : > { %365 = vmatpush.bf16.msra.mxu0 %v849_v30  ;;  %v817_v61 = vor.u32 %v916_v58, %v816_v57  ;;  %v203_v63 = vld [vmem:[%s1279_s28 + $0x10] sm:$0xff]  ;;  %v821_v0 = vor.u32 %v915_v59, %v818_v60  ;;  %v206_v2 = vld [vmem:[%s1279_s28 + $0x28] sm:$0xff]  ;;  %v208_v3 = vld [vmem:[%s1279_s28 + $0x38] sm:$0xff]  ;;  %s1387_s9 = scalar_lea.vmem (%p1171_p4), %s1443_s3, %s935_s6  }
  0x20   : > { %421 = vmatpush.bf16.msra.mxu2 %v853_v33  ;;  %898 = vmatmul.msk.bf16.vlgmr.msra.gmra.mxu3 %vm349_vm0, %v216_v52  ;;  %v215_v1 = vpack.c.bf16 %v203_v63, %v201_v62  ;;  %v218_v4 = vpack.c.bf16 %v208_v3, %v206_v2  ;;  %v205_v5 = vld [vmem:[%s1279_s28 + $0x20] sm:$0xff]  ;;  %v207_v6 = vld [vmem:[%s1279_s28 + $0x30] sm:$0xff]  ;;  %v210_v8 = vld [vmem:[%s1279_s28 + $0x48] sm:$0xff] }
  0x21   : > { %894 = vmatmul.msk.bf16.vlgmr.msra.gmra.mxu1 %vm349_vm0, %v216_v52  ;;  %v217_v7 = vpack.c.bf16 %v207_v6, %v205_v5  ;;  %v212_v9 = vld [vmem:[%s1279_s28 + $0x58] sm:$0xff]  ;;  %v209_v11 = vld [vmem:[%s1279_s28 + $0x40] sm:$0xff]  ;;  %v211_v12 = vld [vmem:[%s1279_s28 + $0x50] sm:$0xff] }
  0x22   : > { %v220_v10 = vpack.c.bf16 %v212_v9, %v210_v8  ;;  %v219_v13 = vpack.c.bf16 %v211_v12, %v209_v11  ;;  %v214_v14 = vld [vmem:[%s1279_s28 + $0x68] sm:$0xff]  ;;  %v213_v16 = vld [vmem:[%s1279_s28 + $0x60] sm:$0xff]  ;;  %s1124_s28 = smov 96  }
  0x23   : > { %366 = vmatpush.bf16.msra.mxu0 %v841_v40  ;;  %v222_v15 = vpack.c.bf16 %v214_v14, %v214_v14  ;;  %v221_v17 = vpack.c.bf16 %v213_v16, %v213_v16  ;;  %v243_v20 = vld [vmem:[%s1442_s2] sm:$0x3] }
  0x24   : > { %422 = vmatpush.bf16.msra.mxu2 %v845_v41  ;;  %v1330_v22 = vperm.slane %v243_v20, 0  ;;  %v1333_v26 = vperm.slane %v243_v20, 1 }
  0x27   : > { %367 = vmatpush.bf16.msra.mxu0 %v833_v46 }
  0x28   : > { %423 = vmatpush.bf16.msra.mxu2 %v837_v49 }
  0x2b   : > { %368 = vmatpush.bf16.msra.mxu0 %v825_v55 }
  0x2c   : > { %424 = vmatpush.bf16.msra.mxu2 %v829_v56 }
  0x2f   : > { %369 = vmatpush.bf16.msra.mxu0 %v817_v61 }
  0x30   : > { %425 = vmatpush.bf16.msra.mxu2 %v821_v0  ;;  %899 = vmatmul.msk.bf16.gmra.mxu3 %vm349_vm0, %v218_v4 }
  0x31   : > { %895 = vmatmul.msk.bf16.gmra.mxu1 %vm349_vm0, %v218_v4 }
  0x32   : > { %370 = vmatmul.bf16.vlgmr.msra.gmra.mxu0 %v215_v1 }
  0x33   : > { %426 = vmatmul.bf16.vlgmr.msra.gmra.mxu2 %v215_v1 }
  0x40   : > { %900 = vmatmul.msk.bf16.gmra.mxu3 %vm349_vm0, %v220_v10 }
  0x41   : > { %896 = vmatmul.msk.bf16.gmra.mxu1 %vm349_vm0, %v220_v10 }
  0x42   : > { %375 = vmatmul.bf16.gmra.mxu0 %v217_v7 }
  0x43   : > { %431 = vmatmul.bf16.gmra.mxu2 %v217_v7 }
  0x50   : > { %901 = vmatmul.msk.bf16.gmra.mxu3 %vm349_vm0, %v222_v15 }
  0x51   : > { %897 = vmatmul.msk.bf16.gmra.mxu1 %vm349_vm0, %v222_v15 }
  0x52   : > { %380 = vmatmul.bf16.gmra.mxu0 %v219_v13 }
  0x53   : > { %436 = vmatmul.bf16.gmra.mxu2 %v219_v13 }
  0x62   : > { %385 = vmatmul.bf16.gmra.mxu0 %v221_v17 }
  0x63   : > { %441 = vmatmul.bf16.gmra.mxu2 %v221_v17 }
  0x9e   : > { %v399_v18 = vpop.f32.mrf.mxu1 }
  0xa3   : > { %v455_v19 = vpop.f32.mrf.mxu3 }
  0xa6   : > { %v401_v21 = vpop.f32.mrf.mxu1 }
  0xab   : > { %v457_v25 = vpop.f32.mrf.mxu3 }
  0xae   : > { %v404_v27 = vpop.f32.mrf.mxu1 }
  0xaf   : > { %v371_v23 = vpop.f32.mrf.mxu0 }
  0xb0   : > { %v372_v24 = vadd.f32 %v371_v23, %v1330_v22 }
  0xb2   : > { %v400_v28 = vadd.f32 %v399_v18, %v372_v24 }
  0xb3   : > { %v460_v34 = vpop.f32.mrf.mxu3 }
  0xb4   : > { %v474_v32 = vmax.f32 %v400_v28, 0.0 }
  0xb6   : > { %v427_v29 = vpop.f32.mrf.mxu2  ;;  %v406_v37 = vpop.f32.mrf.mxu1 }
  0xb7   : > { %v428_v30 = vadd.f32 %v427_v29, %v1333_v26  ;;  %v373_v31 = vpop.f32.mrf.mxu0 }
  0xb8   : > { %v374_v36 = vadd.f32 %v373_v31, %v1330_v22 }
  0xb9   : > { %v456_v33 = vadd.f32 %v455_v19, %v428_v30 }
  0xba   : > { %v402_v40 = vadd.f32 %v401_v21, %v374_v36 }
  0xbb   : > { %v475_v35 = vmax.f32 %v456_v33, 0.0  ;;  %v462_v45 = vpop.f32.mrf.mxu3 }
  0xbc   : > { %v476_v46 = vmax.f32 %v402_v40, 0.0 }
  0xbd   : > { %v1337_v38 = vmax.f32 %v474_v32, %v475_v35 }
  0xbe   : > { %v429_v39 = vpop.f32.mrf.mxu2  ;;  %v409_v48 = vpop.f32.mrf.mxu1 }
  0xbf   : > { %v430_v41 = vadd.f32 %v429_v39, %v1333_v26  ;;  %495 = vrot.lane.b32.xlu0 %v1337_v38, %s1123_s27  ;;  %v376_v42 = vpop.f32.mrf.mxu0 }
  0xc0   : > { %v377_v44 = vadd.f32 %v376_v42, %v1330_v22 }
  0xc1   : > { %v458_v43 = vadd.f32 %v457_v25, %v430_v41 }
  0xc2   : > { %v405_v49 = vadd.f32 %v404_v27, %v377_v44 }
  0xc3   : > { %v477_v47 = vmax.f32 %v458_v43, 0.0  ;;  %v465_v56 = vpop.f32.mrf.mxu3 }
  0xc4   : > { %v478_v54 = vmax.f32 %v405_v49, 0.0 }
  0xc5   : > { %v1343_v50 = vmax.f32 %v476_v46, %v477_v47 }
  0xc6   : > { %v432_v51 = vpop.f32.mrf.mxu2  ;;  %v411_v59 = vpop.f32.mrf.mxu1 }
  0xc7   : > { %v433_v52 = vadd.f32 %v432_v51, %v1333_v26  ;;  %497 = vrot.lane.b32.xlu0 %v1343_v50, %s1123_s27  ;;  %v378_v53 = vpop.f32.mrf.mxu0 }
  0xc8   : > { %v379_v58 = vadd.f32 %v378_v53, %v1330_v22 }
  0xc9   : > { %v461_v55 = vadd.f32 %v460_v34, %v433_v52 }
  0xca   : > { %v407_v62 = vadd.f32 %v406_v37, %v379_v58 }
  0xcb   : > { %v479_v57 = vmax.f32 %v461_v55, 0.0  ;;  %v467_v3 = vpop.f32.mrf.mxu3 }
  0xcc   : > { %v480_v4 = vmax.f32 %v407_v62, 0.0 }
  0xcd   : > { %v490_v60 = vmax.f32 %v478_v54, %v479_v57 }
  0xce   : > { %v434_v61 = vpop.f32.mrf.mxu2  ;;  %v414_v6 = vpop.f32.mrf.mxu1 }
  0xcf   : > { %v435_v63 = vadd.f32 %v434_v61, %v1333_v26  ;;  %499 = vrot.lane.b32.xlu1 %v490_v60, %s1123_s27  ;;  %v381_v0 = vpop.f32.mrf.mxu0 }
  0xd0   : > { %v382_v2 = vadd.f32 %v381_v0, %v1330_v22 }
  0xd1   : > { %v463_v1 = vadd.f32 %v462_v45, %v435_v63 }
  0xd2   : > { %v410_v7 = vadd.f32 %v409_v48, %v382_v2 }
  0xd3   : > { %v481_v5 = vmax.f32 %v463_v1, 0.0  ;;  %v470_v14 = vpop.f32.mrf.mxu3 }
  0xd4   : > { %v482_v12 = vmax.f32 %v410_v7, 0.0 }
  0xd5   : > { %v491_v8 = vmax.f32 %v480_v4, %v481_v5 }
  0xd6   : > { %v437_v9 = vpop.f32.mrf.mxu2  ;;  %v416_v17 = vpop.f32.mrf.mxu1 }
  0xd7   : > { %v438_v10 = vadd.f32 %v437_v9, %v1333_v26  ;;  %501 = vrot.lane.b32.xlu1 %v491_v8, %s1123_s27  ;;  %v383_v11 = vpop.f32.mrf.mxu0 }
  0xd8   : > { %v384_v16 = vadd.f32 %v383_v11, %v1330_v22 }
  0xd9   : > { %v466_v13 = vadd.f32 %v465_v56, %v438_v10 }
  0xda   : > { %v412_v20 = vadd.f32 %v411_v59, %v384_v16 }
  0xdb   : > { %v483_v15 = vmax.f32 %v466_v13, 0.0  ;;  %v472_v27 = vpop.f32.mrf.mxu3 }
  0xdc   : > { %v484_v28 = vmax.f32 %v412_v20, 0.0 }
  0xdd   : > { %v492_v18 = vmax.f32 %v482_v12, %v483_v15 }
  0xde   : > { %v439_v19 = vpop.f32.mrf.mxu2 }
  0xdf   : > { %v440_v21 = vadd.f32 %v439_v19, %v1333_v26  ;;  %503 = vrot.lane.b32.xlu2 %v492_v18, %s1123_s27  ;;  %v386_v23 = vpop.f32.mrf.mxu0 }
  0xe0   : > { %v387_v25 = vadd.f32 %v386_v23, %v1330_v22 }
  0xe1   : > { %v468_v24 = vadd.f32 %v467_v3, %v440_v21 }
  0xe2   : > { %v415_v30 = vadd.f32 %v414_v6, %v387_v25 }
  0xe3   : > { %v485_v29 = vmax.f32 %v468_v24, 0.0 }
  0xe4   : > { %v486_v35 = vmax.f32 %v415_v30, 0.0 }
  0xe5   : > { %v493_v31 = vmax.f32 %v484_v28, %v485_v29 }
  0xe6   : > { %v442_v32 = vpop.f32.mrf.mxu2 }
  0xe7   : > { %v443_v33 = vadd.f32 %v442_v32, %v1333_v26  ;;  %505 = vrot.lane.b32.xlu2 %v493_v31, %s1123_s27  ;;  %v388_v34 = vpop.f32.mrf.mxu0 }
  0xe9   : > { %v471_v36 = vadd.f32 %v470_v14, %v443_v33 }
  0xeb   : > { %v487_v37 = vmax.f32 %v471_v36, 0.0 }
  0xed   : > { %v494_v39 = vmax.f32 %v486_v35, %v487_v37 }
  0xee   : > { %v444_v40 = vpop.f32.mrf.mxu2 }
  0xef   : > { %507 = vrot.lane.b32.xlu0 %v494_v39, %s1123_s27 }
 0x131   : > { %v496_v41 = vpop.permute.xlu0 %495 }
 0x132   : > { %v509_v22 = vmax.f32 %v1337_v38, %v496_v41 }
 0x134   : > { %516 = vrot.lane.b32.xlu1 %v509_v22, %s1124_s28 }
 0x139   : > { %v498_v42 = vpop.permute.xlu0 %497  ;;  %v504_v26 = vpop.permute.xlu2 %503 }
 0x13a   : > { %v510_v43 = vmax.f32 %v1343_v50, %v498_v42  ;;  %v513_v45 = vmax.f32 %v492_v18, %v504_v26 }
 0x13c   : > { %518 = vrot.lane.b32.xlu2 %v510_v43, %s1124_s28 }
 0x141   : > { %v500_v44 = vpop.permute.xlu1 %499  ;;  %v506_v47 = vpop.permute.xlu2 %505 }
 0x142   : > { %v511_v46 = vmax.f32 %v490_v60, %v500_v44  ;;  %v514_v49 = vmax.f32 %v493_v31, %v506_v47 }
 0x144   : > { %520 = vrot.lane.b32.xlu0 %v511_v46, %s1124_s28  ;;  %524 = vrot.lane.b32.xlu2 %v513_v45, %s1124_s28 }
 0x149   : > { %v502_v48 = vpop.permute.xlu1 %501 }
 0x14a   : > { %v512_v51 = vmax.f32 %v491_v8, %v502_v48 }
 0x14c   : > { %526 = vrot.lane.b32.xlu0 %v514_v49, %s1124_s28  ;;  %522 = vrot.lane.b32.xlu1 %v512_v51, %s1124_s28 }
 0x161   : > { %v508_v52 = vpop.permute.xlu0 %507 }
 0x162   : > { %v515_v38 = vmax.f32 %v494_v39, %v508_v52 }
 0x164   : > { %528 = vrot.lane.b32.xlu1 %v515_v38, %s1124_s28 }
 0x196   : > { %v519_v53 = vpop.permute.xlu2 %518 }
 0x197   : > { %v531_v54 = vmax.f32 %v510_v43, %v519_v53 }
 0x199   : > { %539 = vrot.lane.b32.xlu0 %v531_v54, %s1125_s29 }
 0x19e   : > { %v525_v50 = vpop.permute.xlu2 %524 }
 0x19f   : > { %v534_v55 = vmax.f32 %v513_v45, %v525_v50 }
 0x1a1   : > { %545 = vrot.lane.b32.xlu0 %v534_v55, %s1125_s29 }
 0x1a6   : > { %v517_v56 = vpop.permute.xlu1 %516 }
 0x1a7   : > { %v530_v57 = vmax.f32 %v509_v22, %v517_v56 }
 0x1a9   : > { %537 = vrot.lane.b32.xlu2 %v530_v57, %s1125_s29 }
 0x1b6   : > { %v521_v58 = vpop.permute.xlu0 %520 }
 0x1b7   : > { %v532_v59 = vmax.f32 %v511_v46, %v521_v58 }
 0x1b9   : > { %541 = vrot.lane.b32.xlu1 %v532_v59, %s1125_s29 }
 0x1be   : > { %v523_v60 = vpop.permute.xlu1 %522  ;;  %v527_v61 = vpop.permute.xlu0 %526 }
 0x1bf   : > { %v533_v62 = vmax.f32 %v512_v51, %v523_v60  ;;  %v535_v63 = vmax.f32 %v514_v49, %v527_v61 }
 0x1c1   : > { %543 = vrot.lane.b32.xlu2 %v533_v62, %s1125_s29  ;;  %547 = vrot.lane.b32.xlu1 %v535_v63, %s1125_s29 }
 0x1d6   : > { %v529_v0 = vpop.permute.xlu1 %528 }
 0x1d7   : > { %v536_v1 = vmax.f32 %v515_v38, %v529_v0 }
 0x1d9   : > { %549 = vrot.lane.b32.xlu2 %v536_v1, %s1125_s29 }
 0x203   : > { %v538_v2 = vpop.permute.xlu2 %537 }
 0x204   : > { %v551_v3 = vmax.f32 %v530_v57, %v538_v2 }
 0x206   : > { %559 = vst.msk [vmem:[%s1364_s5] sm:$0xff] %vm558_vm1, %v551_v3 }
 0x20b   : > { %v540_v4 = vpop.permute.xlu0 %539 }
 0x20c   : > { %v552_v5 = vmax.f32 %v531_v54, %v540_v4 }
 0x20e   : > { %560 = vst.msk [vmem:[%s1364_s5 + $0x8] sm:$0xff] %vm558_vm1, %v552_v5 }
 0x213   : > { %v546_v6 = vpop.permute.xlu0 %545 }
 0x214   : > { %v555_v7 = vmax.f32 %v534_v55, %v546_v6 }
 0x216   : > { %563 = vst.msk [vmem:[%s1364_s5 + $0x20] sm:$0xff] %vm558_vm1, %v555_v7 }
 0x21b   : > { %v544_v8 = vpop.permute.xlu2 %543 }
 0x21c   : > { %v554_v9 = vmax.f32 %v533_v62, %v544_v8 }
 0x21e   : > { %562 = vst.msk [vmem:[%s1364_s5 + $0x18] sm:$0xff] %vm558_vm1, %v554_v9 }
 0x22b   : > { %v542_v10 = vpop.permute.xlu1 %541 }
 0x22c   : > { %v553_v11 = vmax.f32 %v532_v59, %v542_v10 }
 0x22e   : > { %561 = vst.msk [vmem:[%s1364_s5 + $0x10] sm:$0xff] %vm558_vm1, %v553_v11 }
 0x233   : > { %v550_v12 = vpop.permute.xlu2 %549  ;;  %v548_v13 = vpop.permute.xlu1 %547  ;;  %572 = sbr.rel (!%p1171_p4) target bundleno = 622 (0x26e), region = 36 }
 0x234   : > { %v557_v14 = vmax.f32 %v536_v1, %v550_v12  ;;  %v556_v15 = vmax.f32 %v535_v63, %v548_v13 }
 0x236   : > { %565 = vst.msk [vmem:[%s1364_s5 + $0x30] sm:$0xff] %vm558_vm1, %v557_v14 }
 0x237   : > { %564 = vst.msk [vmem:[%s1364_s5 + $0x28] sm:$0xff] %vm558_vm1, %v556_v15 }
 0x238   : > { %s1452_s12 = smov (!%p575_p8, %s574_s12), 7 }
 0x239   : > { %s902_s10 = sshll.u32 %s1452_s12, 3 }
 0x23a   : > { %p905_p9 = scmp.eq.s32.totalorder %s902_s10, 0 }
 0x23b   : > { %1029 = sdivrem.u32 (!%p905_p9), %s1452_s12, 7 }
 0x23c   : > { %583 = sbr.rel (%p905_p9) target bundleno = 622 (0x26e), region = 40 }
 0x244   : > { %s1393_s20 = spop.drf %1029 }
 0x245   : > { %s1031_s11 = spop.drf %1029  ;;  %p906_p10 = scmp.le.s32.totalorder %s1393_s20, 0 }
 0x246   : > { %s1445_s15 = smov (!%p906_p10), %s1387_s9  ;;  %s1446_s25 = smov (!%p906_p10), %s1364_s5 }
 0x247   : > { %764 = sbr.rel (%p906_p10) target bundleno = 596 (0x254), region = 116  ;;  %s1402_s14 = smov (!%p906_p10), 0  }
 0x248   : > { %s1404_s17 = smov (!%p906_p10), 0  }
 0x24c LB: >> { %v660_v16 = vld [vmem:[%s1097_s25] sm:$0xff]  ;;  %v662_v17 = vld [vmem:[%s1097_s25 + $0x8] sm:$0xff]  ;;  %v664_v18 = vld [vmem:[%s1097_s25 + $0x10] sm:$0xff]  ;;  %s674_s18 = sadd.s32 1, %s1101_s14  ;;  %s654_s17 = sadd.s32 1, %s1105_s17   ;;  %s1105_s17 = sphi %s1404_s17, %s654_s17   ;;  %s1101_s14 = sphi %s1402_s14, %s1447_s14   ;;  %s1097_s25 = sphi %s1446_s25, %s679_s25   ;;  %s1093_s15 = sphi %s1445_s15, %s680_s15  }
 0x24d   : >> { %661 = vst [vmem:[%s1093_s15] sm:$0xff] %v660_v16  ;;  %v666_v19 = vld [vmem:[%s1097_s25 + $0x18] sm:$0xff]  ;;  %p675_p11 = scmp.ge.s32.totalorder %s674_s18, %s1393_s20  ;;  %v668_v20 = vld [vmem:[%s1097_s25 + $0x20] sm:$0xff]  ;;  %v670_v21 = vld [vmem:[%s1097_s25 + $0x28] sm:$0xff]  ;;  %p653_p12 = scmp.ge.s32.totalorder %s654_s17, %s1393_s20 }
 0x24e   : >> { %663 = vst [vmem:[%s1093_s15 + $0x8] sm:$0xff] %v662_v17  ;;  %v672_v23 = vld [vmem:[%s1097_s25 + $0x30] sm:$0xff] }
 0x24f   : >> { %665 = vst [vmem:[%s1093_s15 + $0x10] sm:$0xff] %v664_v18  ;;  %s1454_s18 = smov (%p675_p11, %s674_s18), 0  ;;  %656 = sbr.rel (!%p653_p12) target bundleno = 588 (0x24c), region = 122 }
 0x250   : >> { %667 = vst [vmem:[%s1093_s15 + $0x18] sm:$0xff] %v666_v19  ;;  %s677_s21 = smul.u32 56, %s1454_s18  ;;  %s1447_s14 = smov %s1454_s18 }
 0x251   : >> { %669 = vst [vmem:[%s1093_s15 + $0x20] sm:$0xff] %v668_v20 }
 0x252   : >> { %671 = vst [vmem:[%s1093_s15 + $0x28] sm:$0xff] %v670_v21  ;;  %s679_s25 = scalar_lea.vmem %s1364_s5, %s677_s21 [#allocation2]  }
 0x253   : >> { %673 = vst [vmem:[%s1093_s15 + $0x30] sm:$0xff] %v672_v23  ;;  %s680_s15 = scalar_lea.vmem %s1387_s9, %s677_s21  }
 0x254 PF: > { %1032 = sdivrem.u32 %s1452_s12, 7 }
 0x255   : > { %s907_s22 = smul.u32 56, %s1393_s20 }
 0x257   : > { %s1425_s23 = scalar_lea.vmem %s1364_s5, %s907_s22 [#allocation2]   ;;  %s687_s24 = scalar_lea.vmem %s1387_s9, %s907_s22  }
 0x25d   : > { %s1033_s26 = spop.drf %1032 }
 0x25e   : > { %s1034_s27 = spop.drf %1032 }
 0x25f   : > { %p909_p13 = scmp.le.s32.totalorder %s1034_s27, 0 }
 0x260   : > { %s1107_s28 = smov (!%p909_p13), %s687_s24   ;;  %s1111_s29 = smov (!%p909_p13), %s1425_s23  }
 0x261   : > { %778 = sbr.rel (%p909_p13) target bundleno = 622 (0x26e), region = 127  ;;  %s1115_s30 = smov (!%p909_p13), 0  }
 0x262   : > { %s1119_s4 = smov (!%p909_p13), 0  }
 0x266 LB: >> { %v697_v24 = vld [vmem:[%s1113_s29] sm:$0xff]  ;;  %s699_s5 = sadd.s32 1, %s1117_s30  ;;  %s691_s4 = sadd.s32 1, %s1121_s4   ;;  %s1121_s4 = sphi %s1119_s4, %s691_s4   ;;  %s1117_s30 = sphi %s1115_s30, %s1116_s30   ;;  %s1113_s29 = sphi %s1111_s29, %s704_s29   ;;  %s1109_s28 = sphi %s1107_s28, %s705_s28  }
 0x267   : >> { %698 = vst [vmem:[%s1109_s28] sm:$0xff] %v697_v24  ;;  %p700_p0 = scmp.ge.s32.totalorder %s699_s5, %s1034_s27  ;;  %p690_p1 = scmp.ge.s32.totalorder %s691_s4, %s1034_s27 }
 0x269   : >> { %s1456_s5 = smov (%p700_p0, %s699_s5), 0  ;;  %693 = sbr.rel (!%p690_p1) target bundleno = 614 (0x266), region = 133 }
 0x26a   : >> { %s910_s12 = sshll.u32 %s1456_s5, 3  ;;  %s1116_s30 = smov %s1456_s5  }
 0x26b   : >> { %s704_s29 = scalar_lea.vmem %s1425_s23, %s910_s12 [#allocation2]   ;;  %s705_s28 = scalar_lea.vmem %s687_s24, %s910_s12  }
 0x26e PF: > { %p10_p2 = scmp.ge.s32.totalorder %s1161_s16, 6   ;;  %s1448_s12 = smov %s1085_s13 }
 0x26f   : > { %s1449_s13 = smov %s1169_s19  ;;  %s1450_s14 = smov %s1161_s16 }
 0x270   :  { %12 = sbr.rel (!%p10_p2) target bundleno = 2 (0x2), region = 144 }

</bundles_post_ra>
